<compile_context>
chip_gen: v5e
topology: v5e:2x2
jax: 0.10.0
libtpu: 0.0.40
codegen_flags: <defaults>
</compile_context>

<pallas_src>
import functools
from itertools import permutations

import numpy as np
import jax
import jax.numpy as jnp
from jax import lax
from jax.experimental import pallas as pl
from jax.experimental.pallas import tpu as pltpu

try:  # exact Hungarian solver (preferred)
    from scipy.optimize import linear_sum_assignment as _scipy_lsa
except Exception:  # pragma: no cover
    _scipy_lsa = None

_VMEM = pl.BlockSpec(memory_space=pltpu.MemorySpace.VMEM)
_NEG = -1.0e9  # logit pad value: softplus -> 0, sigmoid -> 0, bce -> 0


def _round_up(x, m):
    return ((x + m - 1) // m) * m


def _nm_dot(a, b):
    # einsum 'nc,mc->nm' on the MXU
    return lax.dot_general(a, b, (((1,), (1,)), ((), ())),
                           preferred_element_type=jnp.float32)


# ---------------------------------------------------------------------------
# Kernel 1: batched Hungarian cost matrix, tiled over the superpoint axis N
# grid = (B, N_pad // NT);  B "parallel", N "arbitrary" (accumulated)
# ---------------------------------------------------------------------------
def _cost_kernel(cw, inv_n, pl_ref, pm_ref, toh_ref, tm_ref, tcnt_ref, c_ref,
                 acc_prod, acc_sp, acc_sig):
    n = pl.program_id(1)

    @pl.when(n == 0)
    def _init():
        acc_prod[...] = jnp.zeros_like(acc_prod)
        acc_sp[...] = jnp.zeros_like(acc_sp)
        acc_sig[...] = jnp.zeros_like(acc_sig)

    x = pm_ref[...]                               # (n_q, NT) logits (pad cols = -1e9)
    t = tm_ref[...]                               # (MAX_I, NT) targets (pad = 0)

    # share exp(-|x|) between softplus and sigmoid (one exp, one log1p, one div)
    e = jnp.exp(-jnp.abs(x))
    sp = jnp.maximum(x, 0.0) + jnp.log1p(e)       # softplus(x)
    inv = 1.0 / (1.0 + e)
    sig = jnp.where(x >= 0.0, inv, e * inv)       # sigmoid(x)

    # single stacked matmul:  rows [:n_q] = sig@t^T (dice numer),
    #                         rows [n_q:] = (-x)@t^T (fused BCE cost)
    stack = jnp.concatenate([sig, -x], axis=0)    # (2*n_q, NT)
    acc_prod[...] += _nm_dot(stack, t)            # (2*n_q, MAX_I)
    acc_sp[...] += jnp.sum(sp, axis=-1, keepdims=True)
    acc_sig[...] += jnp.sum(sig, axis=-1, keepdims=True)

    @pl.when(n == pl.num_programs(1) - 1)
    def _finalize():
        n_q = pm_ref.shape[0]
        prod = acc_prod[...]
        sig_t = prod[:n_q, :]                     # (n_q, MAX_I)
        negx_t = prod[n_q:, :]                    # (n_q, MAX_I)

        # cost_class = -softmax(pred_label)[:, tgt_idx]  (gather == one-hot matmul)
        logits = pl_ref[...]                      # (n_q, C+1)
        m = jnp.max(logits, axis=-1, keepdims=True)
        ez = jnp.exp(logits - m)
        prob = ez / jnp.sum(ez, axis=-1, keepdims=True)
        cost_class = -_nm_dot(prob, toh_ref[...])

        # fused batch_sigmoid_bce_loss:  (rowsum(softplus(x)) + (-x)@t^T) / N
        cost_mask = (acc_sp[...] + negx_t) * inv_n

        # batch_dice_loss (target col-sums precomputed outside the kernel)
        t_row = tcnt_ref[...]                     # (1, MAX_I)
        cost_dice = 1.0 - (2.0 * sig_t + 1.0) / (acc_sig[...] + t_row + 1.0)

        # bbox L1 term is added outside the kernel (3-wide lane layout is wasteful)
        c_ref[...] = cw[0] * cost_class + cw[1] * cost_mask + cw[2] * cost_dice


def cost_matrices(pred_labels, pred_masks_p, tgt_onehot, tgt_mask, tgt_colsum,
                  cost_weight, n_real, nt):
    B, n_q, Cp1 = pred_labels.shape
    MAX_I = tgt_mask.shape[1]
    N_pad = pred_masks_p.shape[2]
    kern = functools.partial(_cost_kernel,
                             tuple(float(w) for w in cost_weight),
                             1.0 / float(n_real))
    return pl.pallas_call(
        kern,
        out_shape=jax.ShapeDtypeStruct((B, n_q, MAX_I), jnp.float32),
        grid_spec=pltpu.PrefetchScalarGridSpec(
            num_scalar_prefetch=0,
            grid=(B, N_pad // nt),
            in_specs=[
                pl.BlockSpec((None, n_q, Cp1), lambda b, n: (b, 0, 0)),
                pl.BlockSpec((None, n_q, nt), lambda b, n: (b, 0, n)),
                pl.BlockSpec((None, MAX_I, Cp1), lambda b, n: (b, 0, 0)),
                pl.BlockSpec((None, MAX_I, nt), lambda b, n: (b, 0, n)),
                pl.BlockSpec((None, 1, MAX_I), lambda b, n: (b, 0, 0)),
            ],
            out_specs=pl.BlockSpec((None, n_q, MAX_I), lambda b, n: (b, 0, 0)),
            scratch_shapes=[
                pltpu.VMEM((2 * n_q, MAX_I), jnp.float32),
                pltpu.VMEM((n_q, 1), jnp.float32),
                pltpu.VMEM((n_q, 1), jnp.float32),
            ],
        ),
        compiler_params=pltpu.CompilerParams(
            dimension_semantics=("parallel", "arbitrary")),
    )(pred_labels, pred_masks_p, tgt_onehot, tgt_mask, tgt_colsum)


# ---------------------------------------------------------------------------
# Kernel 2: weighted cross-entropy (class loss); two scalars packed lane-dense
# ---------------------------------------------------------------------------
def _ce_kernel(logits_ref, onehot_ref, cw_ref, out_ref):
    x = logits_ref[...]                           # (M, C+1)
    oh = onehot_ref[...]                          # (M, C+1)
    cw = cw_ref[...]                              # (1, C+1)
    m = jnp.max(x, axis=-1, keepdims=True)
    lse = m + jnp.log(jnp.sum(jnp.exp(x - m), axis=-1, keepdims=True))
    logp = x - lse
    nll = -jnp.sum(oh * logp, axis=-1, keepdims=True)     # (M, 1)
    w = jnp.sum(oh * cw, axis=-1, keepdims=True)          # (M, 1)
    lane = lax.broadcasted_iota(jnp.int32, out_ref.shape, 1)
    out_ref[...] = (jnp.where(lane == 0, jnp.sum(w * nll), 0.0)
                    + jnp.where(lane == 1, jnp.sum(w), 0.0))


def weighted_cross_entropy(logits, onehot, class_weight):
    out = pl.pallas_call(
        _ce_kernel,
        out_shape=jax.ShapeDtypeStruct((1, 128), jnp.float32),
        in_specs=[_VMEM] * 3,
        out_specs=_VMEM,
    )(logits, onehot, class_weight)
    return out[0, 0] / out[0, 1]


# ---------------------------------------------------------------------------
# Kernel 3: batched, N-tiled mask losses.  Per batch (lane-packed output row):
#   lane0 = bce_sum, lane1 = dice_sum, lane2 = mse_sum (iou>0.5), lane3 = count
# ---------------------------------------------------------------------------
def _mask_kernel(pm_ref, tm_ref, ps_ref, valid_ref, out_ref,
                 acc_bce, acc_sig_t, acc_sig, acc_t, acc_inter, acc_bin, acc_bt):
    n = pl.program_id(1)

    @pl.when(n == 0)
    def _init():
        acc_bce[...] = jnp.zeros_like(acc_bce)
        acc_sig_t[...] = jnp.zeros_like(acc_sig_t)
        acc_sig[...] = jnp.zeros_like(acc_sig)
        acc_t[...] = jnp.zeros_like(acc_t)
        acc_inter[...] = jnp.zeros_like(acc_inter)
        acc_bin[...] = jnp.zeros_like(acc_bin)
        acc_bt[...] = jnp.zeros_like(acc_bt)

    x = pm_ref[...]                               # (K, NT) matched logits
    t = tm_ref[...]                               # (K, NT) matched targets
    v = valid_ref[...]                            # (K, 1)  row validity {0,1}

    e = jnp.exp(-jnp.abs(x))                      # shared with sigmoid
    bce = jnp.maximum(x, 0.0) - x * t + jnp.log1p(e)
    inv = 1.0 / (1.0 + e)
    sig = jnp.where(x >= 0.0, inv, e * inv)
    b_in = (sig >= 0.5).astype(jnp.float32)
    b_t = (t > 0.5).astype(jnp.float32)

    acc_bce[...] += jnp.sum(v * jnp.sum(bce, axis=-1, keepdims=True))
    acc_sig_t[...] += v * jnp.sum(sig * t, axis=-1, keepdims=True)
    acc_sig[...] += v * jnp.sum(sig, axis=-1, keepdims=True)
    acc_t[...] += v * jnp.sum(t, axis=-1, keepdims=True)
    acc_inter[...] += v * jnp.sum(b_in * b_t, axis=-1, keepdims=True)
    acc_bin[...] += v * jnp.sum(b_in, axis=-1, keepdims=True)
    acc_bt[...] += v * jnp.sum(b_t, axis=-1, keepdims=True)

    @pl.when(n == pl.num_programs(1) - 1)
    def _finalize():
        dice = 1.0 - (2.0 * acc_sig_t[...] + 1.0) / (acc_sig[...] + acc_t[...] + 1.0)
        iou = acc_inter[...] / (acc_bt[...] + acc_bin[...] - acc_inter[...] + 1e-6)
        filt = (iou > 0.5).astype(jnp.float32)
        ps = ps_ref[...]                          # (K, 1)
        mse_sum = jnp.sum(filt * (ps - iou) ** 2)
        cnt = jnp.sum(filt)
        lane = lax.broadcasted_iota(jnp.int32, out_ref.shape, 1)
        out_ref[...] = (jnp.where(lane == 0, acc_bce[...], 0.0)
                        + jnp.where(lane == 1, jnp.sum(dice), 0.0)
                        + jnp.where(lane == 2, mse_sum, 0.0)
                        + jnp.where(lane == 3, cnt, 0.0))


def mask_losses(pm_m, tm_m, ps_m, valid, nt):
    B, K, N_pad = pm_m.shape
    return pl.pallas_call(
        _mask_kernel,
        out_shape=jax.ShapeDtypeStruct((B, 8, 128), jnp.float32),
        grid_spec=pltpu.PrefetchScalarGridSpec(
            num_scalar_prefetch=0,
            grid=(B, N_pad // nt),
            in_specs=[
                pl.BlockSpec((None, K, nt), lambda b, n: (b, 0, n)),
                pl.BlockSpec((None, K, nt), lambda b, n: (b, 0, n)),
                pl.BlockSpec((None, K, 1), lambda b, n: (b, 0, 0)),
                pl.BlockSpec((None, K, 1), lambda b, n: (b, 0, 0)),
            ],
            out_specs=pl.BlockSpec((None, 8, 128), lambda b, n: (b, 0, 0)),
            scratch_shapes=[pltpu.VMEM((1, 1), jnp.float32)]
                          + [pltpu.VMEM((K, 1), jnp.float32)] * 6,
        ),
        compiler_params=pltpu.CompilerParams(
            dimension_semantics=("parallel", "arbitrary")),
    )(pm_m, tm_m, ps_m, valid)


# ---------------------------------------------------------------------------
# Host-side Hungarian matching (no Pallas equivalent).
# ---------------------------------------------------------------------------
def _lsa_bruteforce(C):
    # TODO(synk): fallback only (scipy unavailable); factorial cost, tiny problems only.
    C = np.asarray(C, dtype=np.float64)
    n_rows, n_cols = C.shape
    best_cost, best_rows = None, None
    for p in permutations(range(n_rows), n_cols):
        s = float(sum(C[p[j], j] for j in range(n_cols)))
        if best_cost is None or s < best_cost:
            best_cost, best_rows = s, p
    rows = np.array(best_rows, dtype=np.int64)
    cols = np.arange(n_cols, dtype=np.int64)
    order = np.argsort(rows)
    return rows[order], cols[order]


def _linear_sum_assignment(C):
    if _scipy_lsa is not None:
        r, c = _scipy_lsa(C)
        return np.asarray(r, np.int64), np.asarray(c, np.int64)
    return _lsa_bruteforce(C)


# ---------------------------------------------------------------------------
# Criterion (forward pass; aux_outputs branch omitted)
# ---------------------------------------------------------------------------
class CriterionPallas:
    def __init__(self, ignore_label=-100,
                 loss_weight=(1.0, 1.0, 1.0, 1.0, 1.0),
                 cost_weight=(1.0, 1.0, 1.0, 1.0),
                 non_object_weight=0.1, num_class=18):
        self.num_class = num_class
        # ignore_label kept for parity; the reference forward never produces it.
        self.ignore_label = ignore_label
        cw = np.ones(num_class + 1, dtype=np.float32)
        cw[-1] = non_object_weight
        self.class_weight = jnp.asarray(cw)[None, :]           # (1, C+1)
        self.loss_weight = [float(w) for w in loss_weight]
        self.cost_weight = [float(w) for w in cost_weight]

    def forward(self, pred, insts, loss_sim):
        pred_labels = pred['labels']          # (B, n_q, C+1)
        pred_scores = pred['scores']          # (B, n_q, 1)
        pred_masks = pred['masks']            # list of (n_q, N)
        pred_bboxes = pred['bboxes']          # (B, n_q, 3)
        B, n_q, Cp1 = pred_labels.shape
        N = int(pred_masks[0].shape[1])

        # ---- static padding sizes (stable shapes -> one compile) ----
        n_inst_list = [int(np.asarray(inst['gt_labels']).shape[0]) for inst in insts]
        max_inst = max(max(n_inst_list), 1)
        MAX_I = _round_up(max_inst, 128)       # lane-dense cost output
        K_MAX = _round_up(max_inst, 8)         # matched-row padding
        N_pad = _round_up(N, 128)
        NT = 128                               # largest 128-multiple tile <= 2048 that divides N_pad
        for cand in (2048, 1024, 512, 256, 128):
            if N_pad % cand == 0:
                NT = cand
                break

        # ---- build padded target stacks (single H2D copy each) ----
        tgt_onehot_np = np.zeros((B, MAX_I, Cp1), np.float32)
        tgt_mask_np = np.zeros((B, MAX_I, N_pad), np.float32)
        tgt_bbox_np = np.zeros((B, MAX_I, 3), np.float32)
        for b, inst in enumerate(insts):
            k = n_inst_list[b]
            if k == 0:
                continue
            labels = np.asarray(inst['gt_labels']).astype(np.int64)
            tgt_onehot_np[b, np.arange(k), labels] = 1.0
            tgt_mask_np[b, :k, :N] = np.asarray(inst['gt_spmasks'], np.float32)
            tgt_bbox_np[b, :k, :] = np.asarray(inst['gt_bboxes'], np.float32)[:, :3]
        tgt_onehot = jnp.asarray(tgt_onehot_np)
        tgt_mask = jnp.asarray(tgt_mask_np)
        tgt_bbox = jnp.asarray(tgt_bbox_np)
        tgt_colsum = jnp.transpose(jnp.sum(tgt_mask, axis=-1, keepdims=True), (0, 2, 1))

        pred_labels_f = pred_labels.astype(jnp.float32)
        pred_bboxes_f = pred_bboxes.astype(jnp.float32)
        scores_f = jnp.asarray(pred_scores).astype(jnp.float32)
        pred_masks_st = jnp.stack([jnp.asarray(m).astype(jnp.float32)
                                   for m in pred_masks], 0)   # (B, n_q, N)
        if N_pad > N:
            pred_masks_p = jnp.pad(pred_masks_st, ((0, 0), (0, 0), (0, N_pad - N)),
                                   constant_values=_NEG)
        else:
            pred_masks_p = pred_masks_st

        # ---- Hungarian cost matrices: ONE batched kernel, single D2H copy ----
        cost = cost_matrices(pred_labels_f, pred_masks_p, tgt_onehot, tgt_mask,
                             tgt_colsum, self.cost_weight, N, NT)
        cost_bbox = jnp.sum(jnp.abs(pred_bboxes_f[:, :, None, :]
                                    - tgt_bbox[:, None, :, :]), axis=-1)
        cost = cost + self.cost_weight[3] * cost_bbox
        cost_host = np.asarray(cost)           # single blocking transfer before matching

        indices = []
        for b in range(B):
            k = n_inst_list[b]
            if k == 0:
                indices.append((np.zeros(0, np.int64), np.zeros(0, np.int64)))
                continue
            C = np.nan_to_num(cost_host[b, :, :k])
            indices.append(_linear_sum_assignment(C))

        # ---- class loss (weighted CE) ----
        tgt_class = np.full((B, n_q), self.num_class, dtype=np.int64)
        for b, (inst, (iq, ig)) in enumerate(zip(insts, indices)):
            if iq.size:
                tgt_class[b, iq] = np.asarray(inst['gt_labels'])[ig]
        onehot = np.eye(Cp1, dtype=np.float32)[tgt_class.reshape(-1)]
        class_loss = weighted_cross_entropy(
            pred_labels_f.reshape(B * n_q, Cp1), jnp.asarray(onehot), self.class_weight)

        # ---- padded matched indices (device-side gathers, no per-batch D2H) ----
        idx_q_np = np.zeros((B, K_MAX), np.int32)
        idx_gt_np = np.zeros((B, K_MAX), np.int32)
        valid_np = np.zeros((B, K_MAX, 1), np.float32)
        for b, (iq, ig) in enumerate(indices):
            k = int(iq.size)
            if k:
                idx_q_np[b, :k] = iq
                idx_gt_np[b, :k] = ig
                valid_np[b, :k, 0] = 1.0
        idx_q = jnp.asarray(idx_q_np)
        idx_gt = jnp.asarray(idx_gt_np)
        valid = jnp.asarray(valid_np)
        total_matched = int(sum(int(iq.size) for iq, _ in indices))

        # ---- bbox loss (3-wide feature: plain jnp, kept off the MXU lanes) ----
        pb_m = jnp.take_along_axis(pred_bboxes_f, idx_q[:, :, None], axis=1)   # (B,K,3)
        tb_m = jnp.take_along_axis(tgt_bbox, idx_gt[:, :, None], axis=1)       # (B,K,3)
        bbox_loss = jnp.sum(valid * jnp.sum(jnp.abs(pb_m - tb_m), -1, keepdims=True))
        bbox_loss = bbox_loss / float(max(total_matched, 1))

        # ---- mask / score losses: ONE batched, N-tiled kernel ----
        pm_m = jnp.take_along_axis(pred_masks_p, idx_q[:, :, None], axis=1)    # (B,K,N_pad)
        tm_m = jnp.take_along_axis(tgt_mask, idx_gt[:, :, None], axis=1)       # (B,K,N_pad)
        ps_m = jnp.take_along_axis(scores_f, idx_q[:, :, None], axis=1)        # (B,K,1)
        mres = mask_losses(pm_m, tm_m, ps_m, valid, NT)                        # (B,8,128)

        mask_bce_loss = jnp.float32(0.0)
        mask_dice_loss = jnp.float32(0.0)
        score_loss = jnp.float32(0.0)
        for b in range(B):
            k_m = int(indices[b][0].size)
            if k_m == 0:
                continue
            mask_bce_loss = mask_bce_loss + mres[b, 0, 0] / float(k_m * N)
            mask_dice_loss = mask_dice_loss + mres[b, 0, 1] / float(k_m)
            cnt = mres[b, 0, 3]
            score_loss = score_loss + jnp.where(
                cnt > 0, mres[b, 0, 2] / jnp.maximum(cnt, 1.0), 0.0)
        score_loss = score_loss / float(B)
        mask_bce_loss = mask_bce_loss / float(B)
        # NOTE: matching the reference forward() exactly: mask_dice_loss NOT divided by B.

        lw = self.loss_weight
        loss_sim_j = jnp.asarray(loss_sim, jnp.float32)
        loss = (lw[0] * class_loss + lw[1] * mask_bce_loss + lw[2] * mask_dice_loss
                + lw[3] * bbox_loss + lw[4] * score_loss + loss_sim_j)
        # TODO(synk): 'aux_outputs' branch (get_layer_loss) omitted; same batched kernels apply per layer.

        # single host sync at the very end (no per-term float()/item() syncs)
        jax.block_until_ready(loss)
        loss_out = {
            'cls_loss': float(class_loss),
            'bbox_loss': float(bbox_loss),
            'score_loss': float(score_loss),
            'mask_bce_loss': float(mask_bce_loss),
            'mask_dice_loss': float(mask_dice_loss),
            'sim_loss': float(loss_sim_j),
            'loss': float(loss),
        }
        return loss, loss_out

    __call__ = forward


# ---------------------------------------------------------------------------
if __name__ == "__main__":
    B, n_q, NUM_CLASS, N = 2, 8, 18, 300   # N=300 exercises N-tiling + column padding
    key = jax.random.PRNGKey(0)
    ks = jax.random.split(key, 16)

    pred = {
        'labels': jax.random.normal(ks[0], (B, n_q, NUM_CLASS + 1), jnp.float32),
        'scores': jax.nn.sigmoid(jax.random.normal(ks[1], (B, n_q, 1), jnp.float32)),
        'masks': [jax.random.normal(ks[2], (n_q, N), jnp.float32),
                  jax.random.normal(ks[3], (n_q, N), jnp.float32)],
        'bboxes': jax.random.uniform(ks[4], (B, n_q, 3), jnp.float32),
    }

    insts = []
    for b, n_inst in enumerate([3, 2]):
        insts.append({
            'gt_labels': np.asarray(
                jax.random.randint(ks[5 + 3 * b], (n_inst,), 0, NUM_CLASS)),
            'gt_spmasks': np.asarray(
                (jax.random.uniform(ks[6 + 3 * b], (n_inst, N)) > 0.5)
                .astype(jnp.float32)),
            'gt_bboxes': np.asarray(
                jax.random.uniform(ks[7 + 3 * b], (n_inst, 6), jnp.float32)),
        })

    loss_sim = jnp.float32(0.1)
    criterion = CriterionPallas(loss_weight=[1.0, 1.0, 1.0, 1.0, 1.0],
                                cost_weight=[1.0, 1.0, 1.0, 1.0],
                                non_object_weight=0.1, num_class=NUM_CLASS)
    loss, loss_out = criterion(pred, insts, loss_sim)
    jax.block_until_ready(loss)
    assert np.isfinite(float(loss)), "non-finite loss"
    print("KERNEL_OK")
</pallas_src>

<mosaic_0001>
module attributes {stable_mosaic.version = 11 : i64} {
  func.func @_cost_kernel(%arg0: i32, %arg1: i32, %arg2: memref<1x8x19xf32, #tpu.memory_space<vmem>>, %arg3: memref<1x8x128xf32, #tpu.memory_space<vmem>>, %arg4: memref<1x128x19xf32, #tpu.memory_space<vmem>>, %arg5: memref<1x128x128xf32, #tpu.memory_space<vmem>>, %arg6: memref<1x1x128xf32, #tpu.memory_space<vmem>>, %arg7: memref<1x8x128xf32, #tpu.memory_space<vmem>>, %arg8: memref<16x128xf32, #tpu.memory_space<vmem>>, %arg9: memref<8x1xf32, #tpu.memory_space<vmem>>, %arg10: memref<8x1xf32, #tpu.memory_space<vmem>>) attributes {dimension_semantics = [#tpu.dimension_semantics<parallel>, #tpu.dimension_semantics<arbitrary>], iteration_bounds = array<i64: 2, 3>, scalar_prefetch = 0 : i64, scratch_operands = 3 : i64, tpu.core_type = #tpu.core_type<tc>, window_params = [{transform_indices = @transform_0, window_bounds = array<i64: 1, 8, 19>}, {transform_indices = @transform_1, window_bounds = array<i64: 1, 8, 128>}, {transform_indices = @transform_2, window_bounds = array<i64: 1, 128, 19>}, {transform_indices = @transform_3, window_bounds = array<i64: 1, 128, 128>}, {transform_indices = @transform_4, window_bounds = array<i64: 1, 1, 128>}, {transform_indices = @transform_5, window_bounds = array<i64: 1, 8, 128>}]} {
    %c0_i32 = arith.constant 0 : i32
    %0 = arith.cmpi eq, %arg1, %c0_i32 : i32
    %1 = arith.extui %0 : i1 to i32
    %c0_i32_0 = arith.constant 0 : i32
    %2 = arith.cmpi ne, %1, %c0_i32_0 : i32
    scf.if %2 {
      %cst_27 = arith.constant 0.000000e+00 : f32
      %43 = vector.broadcast %cst_27 : f32 to vector<16x128xf32>
      %c0_28 = arith.constant 0 : index
      %c0_29 = arith.constant 0 : index
      %44 = vector.load %arg8[%c0_28, %c0_29] : memref<16x128xf32, #tpu.memory_space<vmem>>, vector<16x128xf32>
      tpu.vector_store %arg8[%c0_28, %c0_29], %43 {strides = array<i32>} : memref<16x128xf32, #tpu.memory_space<vmem>>, vector<16x128xf32>,
      %cst_30 = arith.constant 0.000000e+00 : f32
      %45 = vector.broadcast %cst_30 : f32 to vector<8x1xf32>
      %c0_31 = arith.constant 0 : index
      %c0_32 = arith.constant 0 : index
      %46 = vector.load %arg9[%c0_31, %c0_32] : memref<8x1xf32, #tpu.memory_space<vmem>>, vector<8x1xf32>
      tpu.vector_store %arg9[%c0_31, %c0_32], %45 {strides = array<i32>} : memref<8x1xf32, #tpu.memory_space<vmem>>, vector<8x1xf32>,
      %cst_33 = arith.constant 0.000000e+00 : f32
      %47 = vector.broadcast %cst_33 : f32 to vector<8x1xf32>
      %c0_34 = arith.constant 0 : index
      %c0_35 = arith.constant 0 : index
      %48 = vector.load %arg10[%c0_34, %c0_35] : memref<8x1xf32, #tpu.memory_space<vmem>>, vector<8x1xf32>
      tpu.vector_store %arg10[%c0_34, %c0_35], %47 {strides = array<i32>} : memref<8x1xf32, #tpu.memory_space<vmem>>, vector<8x1xf32>,
    } else {
    }
    %c0 = arith.constant 0 : index
    %c0_1 = arith.constant 0 : index
    %c0_2 = arith.constant 0 : index
    %3 = vector.load %arg3[%c0, %c0_1, %c0_2] : memref<1x8x128xf32, #tpu.memory_space<vmem>>, vector<1x8x128xf32>
    %4 = vector.shape_cast %3 : vector<1x8x128xf32> to vector<8x128xf32>
    %c0_3 = arith.constant 0 : index
    %c0_4 = arith.constant 0 : index
    %c0_5 = arith.constant 0 : index
    %5 = vector.load %arg5[%c0_3, %c0_4, %c0_5] : memref<1x128x128xf32, #tpu.memory_space<vmem>>, vector<1x128x128xf32>
    %6 = vector.shape_cast %5 : vector<1x128x128xf32> to vector<128x128xf32>
    %7 = math.absf %4 : vector<8x128xf32>
    %cst = arith.constant 0.000000e+00 : f32
    %8 = vector.broadcast %cst : f32 to vector<8x128xf32>
    %9 = arith.subf %8, %7 : vector<8x128xf32>
    %10 = math.exp %9 : vector<8x128xf32>
    %cst_6 = arith.constant 0.000000e+00 : f32
    %11 = vector.broadcast %cst_6 : f32 to vector<8x128xf32>
    %12 = arith.maximumf %4, %11 : vector<8x128xf32>
    %13 = math.log1p %10 : vector<8x128xf32>
    %14 = arith.addf %12, %13 : vector<8x128xf32>
    %cst_7 = arith.constant 1.000000e+00 : f32
    %15 = vector.broadcast %cst_7 : f32 to vector<8x128xf32>
    %16 = arith.addf %15, %10 : vector<8x128xf32>
    %cst_8 = arith.constant 1.000000e+00 : f32
    %17 = vector.broadcast %cst_8 : f32 to vector<8x128xf32>
    %18 = arith.divf %17, %16 : vector<8x128xf32>
    %cst_9 = arith.constant 0.000000e+00 : f32
    %19 = vector.broadcast %cst_9 : f32 to vector<8x128xf32>
    %20 = arith.cmpf oge, %4, %19 : vector<8x128xf32>
    %21 = arith.mulf %10, %18 : vector<8x128xf32>
    %22 = arith.select %20, %18, %21 : vector<8x128xi1>, vector<8x128xf32>
    %cst_10 = arith.constant 0.000000e+00 : f32
    %23 = vector.broadcast %cst_10 : f32 to vector<8x128xf32>
    %24 = arith.subf %23, %4 : vector<8x128xf32>
    %25 = tpu.concatenate %22, %24 in 0 : vector<8x128xf32>, vector<8x128xf32> -> vector<16x128xf32>
    %c0_11 = arith.constant 0 : index
    %c0_12 = arith.constant 0 : index
    %26 = vector.load %arg8[%c0_11, %c0_12] : memref<16x128xf32, #tpu.memory_space<vmem>>, vector<16x128xf32>
    %cst_13 = arith.constant dense<0.000000e+00> : vector<16x128xf32>
    %27 = tpu.matmul %25, %6, %cst_13 {dimension_numbers = #tpu.dot_dimension_numbers<[1], [1], [0], [0], [0, 0, 1, 0], [], []>} : vector<16x128xf32>, vector<128x128xf32>, vector<16x128xf32> -> vector<16x128xf32>
    %28 = arith.addf %26, %27 : vector<16x128xf32>
    %c0_14 = arith.constant 0 : index
    %c0_15 = arith.constant 0 : index
    %29 = vector.load %arg8[%c0_14, %c0_15] : memref<16x128xf32, #tpu.memory_space<vmem>>, vector<16x128xf32>
    tpu.vector_store %arg8[%c0_14, %c0_15], %28 {strides = array<i32>} : memref<16x128xf32, #tpu.memory_space<vmem>>, vector<16x128xf32>,
    %c0_16 = arith.constant 0 : index
    %c0_17 = arith.constant 0 : index
    %30 = vector.load %arg9[%c0_16, %c0_17] : memref<8x1xf32, #tpu.memory_space<vmem>>, vector<8x1xf32>
    %cst_18 = arith.constant dense<0.000000e+00> : vector<8xf32>
    %31 = vector.multi_reduction <add>, %14, %cst_18 [1] : vector<8x128xf32> to vector<8xf32>
    %32 = vector.shape_cast %31 : vector<8xf32> to vector<8x1xf32>
    %33 = arith.addf %30, %32 : vector<8x1xf32>
    %c0_19 = arith.constant 0 : index
    %c0_20 = arith.constant 0 : index
    %34 = vector.load %arg9[%c0_19, %c0_20] : memref<8x1xf32, #tpu.memory_space<vmem>>, vector<8x1xf32>
    tpu.vector_store %arg9[%c0_19, %c0_20], %33 {strides = array<i32>} : memref<8x1xf32, #tpu.memory_space<vmem>>, vector<8x1xf32>,
    %c0_21 = arith.constant 0 : index
    %c0_22 = arith.constant 0 : index
    %35 = vector.load %arg10[%c0_21, %c0_22] : memref<8x1xf32, #tpu.memory_space<vmem>>, vector<8x1xf32>
    %cst_23 = arith.constant dense<0.000000e+00> : vector<8xf32>
    %36 = vector.multi_reduction <add>, %22, %cst_23 [1] : vector<8x128xf32> to vector<8xf32>
    %37 = vector.shape_cast %36 : vector<8xf32> to vector<8x1xf32>
    %38 = arith.addf %35, %37 : vector<8x1xf32>
    %c0_24 = arith.constant 0 : index
    %c0_25 = arith.constant 0 : index
    %39 = vector.load %arg10[%c0_24, %c0_25] : memref<8x1xf32, #tpu.memory_space<vmem>>, vector<8x1xf32>
    tpu.vector_store %arg10[%c0_24, %c0_25], %38 {strides = array<i32>} : memref<8x1xf32, #tpu.memory_space<vmem>>, vector<8x1xf32>,
    %c2_i32 = arith.constant 2 : i32
    %40 = arith.cmpi eq, %arg1, %c2_i32 : i32
    %41 = arith.extui %40 : i1 to i32
    %c0_i32_26 = arith.constant 0 : i32
    %42 = arith.cmpi ne, %41, %c0_i32_26 : i32
    scf.if %42 {
      %c0_27 = arith.constant 0 : index
      %c0_28 = arith.constant 0 : index
      %43 = vector.load %arg8[%c0_27, %c0_28] : memref<16x128xf32, #tpu.memory_space<vmem>>, vector<16x128xf32>
      %44 = vector.extract_strided_slice %43 {offsets = [0, 0], sizes = [8, 128], strides = [1, 1]} : vector<16x128xf32> to vector<8x128xf32>
      %45 = vector.extract_strided_slice %43 {offsets = [8, 0], sizes = [8, 128], strides = [1, 1]} : vector<16x128xf32> to vector<8x128xf32>
      %c0_29 = arith.constant 0 : index
      %c0_30 = arith.constant 0 : index
      %c0_31 = arith.constant 0 : index
      %46 = vector.load %arg2[%c0_29, %c0_30, %c0_31] : memref<1x8x19xf32, #tpu.memory_space<vmem>>, vector<1x8x19xf32>
      %47 = vector.shape_cast %46 : vector<1x8x19xf32> to vector<8x19xf32>
      %cst_32 = arith.constant dense<0xFF800000> : vector<8xf32>
      %48 = vector.multi_reduction <maximumf>, %47, %cst_32 [1] : vector<8x19xf32> to vector<8xf32>
      %49 = vector.shape_cast %48 : vector<8xf32> to vector<8x1xf32>
      %50 = vector.broadcast %49 : vector<8x1xf32> to vector<8x19xf32>
      %51 = arith.subf %47, %50 : vector<8x19xf32>
      %52 = math.exp %51 : vector<8x19xf32>
      %cst_33 = arith.constant dense<0.000000e+00> : vector<8xf32>
      %53 = vector.multi_reduction <add>, %52, %cst_33 [1] : vector<8x19xf32> to vector<8xf32>
      %54 = vector.shape_cast %53 : vector<8xf32> to vector<8x1xf32>
      %55 = vector.broadcast %54 : vector<8x1xf32> to vector<8x19xf32>
      %56 = arith.divf %52, %55 : vector<8x19xf32>
      %c0_34 = arith.constant 0 : index
      %c0_35 = arith.constant 0 : index
      %c0_36 = arith.constant 0 : index
      %57 = vector.load %arg4[%c0_34, %c0_35, %c0_36] : memref<1x128x19xf32, #tpu.memory_space<vmem>>, vector<1x128x19xf32>
      %58 = vector.shape_cast %57 : vector<1x128x19xf32> to vector<128x19xf32>
      %cst_37 = arith.constant dense<0.000000e+00> : vector<8x128xf32>
      %59 = tpu.matmul %56, %58, %cst_37 {dimension_numbers = #tpu.dot_dimension_numbers<[1], [1], [0], [0], [0, 0, 1, 0], [], []>} : vector<8x19xf32>, vector<128x19xf32>, vector<8x128xf32> -> vector<8x128xf32>
      %cst_38 = arith.constant 0.000000e+00 : f32
      %60 = vector.broadcast %cst_38 : f32 to vector<8x128xf32>
      %61 = arith.subf %60, %59 : vector<8x128xf32>
      %c0_39 = arith.constant 0 : index
      %c0_40 = arith.constant 0 : index
      %62 = vector.load %arg9[%c0_39, %c0_40] : memref<8x1xf32, #tpu.memory_space<vmem>>, vector<8x1xf32>
      %63 = vector.broadcast %62 : vector<8x1xf32> to vector<8x128xf32>
      %64 = arith.addf %63, %45 : vector<8x128xf32>
      %cst_41 = arith.constant 0.00333333341 : f32
      %65 = vector.broadcast %cst_41 : f32 to vector<8x128xf32>
      %66 = arith.mulf %64, %65 : vector<8x128xf32>
      %c0_42 = arith.constant 0 : index
      %c0_43 = arith.constant 0 : index
      %c0_44 = arith.constant 0 : index
      %67 = vector.load %arg6[%c0_42, %c0_43, %c0_44] : memref<1x1x128xf32, #tpu.memory_space<vmem>>, vector<1x1x128xf32>
      %68 = vector.shape_cast %67 : vector<1x1x128xf32> to vector<1x128xf32>
      %cst_45 = arith.constant 2.000000e+00 : f32
      %69 = vector.broadcast %cst_45 : f32 to vector<8x128xf32>
      %70 = arith.mulf %69, %44 : vector<8x128xf32>
      %cst_46 = arith.constant 1.000000e+00 : f32
      %71 = vector.broadcast %cst_46 : f32 to vector<8x128xf32>
      %72 = arith.addf %70, %71 : vector<8x128xf32>
      %c0_47 = arith.constant 0 : index
      %c0_48 = arith.constant 0 : index
      %73 = vector.load %arg10[%c0_47, %c0_48] : memref<8x1xf32, #tpu.memory_space<vmem>>, vector<8x1xf32>
      %74 = vector.broadcast %73 : vector<8x1xf32> to vector<8x128xf32>
      %75 = vector.broadcast %68 : vector<1x128xf32> to vector<8x128xf32>
      %76 = arith.addf %74, %75 : vector<8x128xf32>
      %cst_49 = arith.constant 1.000000e+00 : f32
      %77 = vector.broadcast %cst_49 : f32 to vector<8x128xf32>
      %78 = arith.addf %76, %77 : vector<8x128xf32>
      %79 = arith.divf %72, %78 : vector<8x128xf32>
      %cst_50 = arith.constant 1.000000e+00 : f32
      %80 = vector.broadcast %cst_50 : f32 to vector<8x128xf32>
      %81 = arith.subf %80, %79 : vector<8x128xf32>
      %cst_51 = arith.constant 1.000000e+00 : f32
      %82 = vector.broadcast %cst_51 : f32 to vector<8x128xf32>
      %83 = arith.mulf %82, %61 : vector<8x128xf32>
      %cst_52 = arith.constant 1.000000e+00 : f32
      %84 = vector.broadcast %cst_52 : f32 to vector<8x128xf32>
      %85 = arith.mulf %84, %66 : vector<8x128xf32>
      %86 = arith.addf %83, %85 : vector<8x128xf32>
      %cst_53 = arith.constant 1.000000e+00 : f32
      %87 = vector.broadcast %cst_53 : f32 to vector<8x128xf32>
      %88 = arith.mulf %87, %81 : vector<8x128xf32>
      %89 = arith.addf %86, %88 : vector<8x128xf32>
      %c0_54 = arith.constant 0 : index
      %c0_55 = arith.constant 0 : index
      %c0_56 = arith.constant 0 : index
      %90 = vector.load %arg7[%c0_54, %c0_55, %c0_56] : memref<1x8x128xf32, #tpu.memory_space<vmem>>, vector<1x8x128xf32>
      %91 = vector.shape_cast %90 : vector<1x8x128xf32> to vector<8x128xf32>
      %92 = vector.shape_cast %89 : vector<8x128xf32> to vector<1x8x128xf32>
      tpu.vector_store %arg7[%c0_54, %c0_55, %c0_56], %92 {strides = array<i32>} : memref<1x8x128xf32, #tpu.memory_space<vmem>>, vector<1x8x128xf32>,
    } else {
    }
    return
  }
  func.func @transform_0(%arg0: i32, %arg1: i32) -> (i32, i32, i32) {
    %c0_i32 = arith.constant 0 : i32
    %c0_i32_0 = arith.constant 0 : i32
    %c0_i32_1 = arith.constant 0 : i32
    return %arg0, %c0_i32, %c0_i32_0 : i32, i32, i32
  }
  func.func @transform_1(%arg0: i32, %arg1: i32) -> (i32, i32, i32) {
    %c0_i32 = arith.constant 0 : i32
    %c0_i32_0 = arith.constant 0 : i32
    return %arg0, %c0_i32, %arg1 : i32, i32, i32
  }
  func.func @transform_2(%arg0: i32, %arg1: i32) -> (i32, i32, i32) {
    %c0_i32 = arith.constant 0 : i32
    %c0_i32_0 = arith.constant 0 : i32
    %c0_i32_1 = arith.constant 0 : i32
    return %arg0, %c0_i32, %c0_i32_0 : i32, i32, i32
  }
  func.func @transform_3(%arg0: i32, %arg1: i32) -> (i32, i32, i32) {
    %c0_i32 = arith.constant 0 : i32
    %c0_i32_0 = arith.constant 0 : i32
    return %arg0, %c0_i32, %arg1 : i32, i32, i32
  }
  func.func @transform_4(%arg0: i32, %arg1: i32) -> (i32, i32, i32) {
    %c0_i32 = arith.constant 0 : i32
    %c0_i32_0 = arith.constant 0 : i32
    %c0_i32_1 = arith.constant 0 : i32
    return %arg0, %c0_i32, %c0_i32_0 : i32, i32, i32
  }
  func.func @transform_5(%arg0: i32, %arg1: i32) -> (i32, i32, i32) {
    %c0_i32 = arith.constant 0 : i32
    %c0_i32_0 = arith.constant 0 : i32
    %c0_i32_1 = arith.constant 0 : i32
    return %arg0, %c0_i32, %c0_i32_0 : i32, i32, i32
  }
}

</mosaic_0001>

<bundles_post_ra>
// kernel: tpu_custom_call.1
= control target key start
LH: loop header
LB: loop body
LE: loop exit
PB: predicated region body
PF: predicated region fallthrough
CT: control target
= control target key end

     0   :  { %s1391_s0 = inlined_call_operand.vmem [shape: f32[2,8,19], index: 0, kind: input, shape index: {}]   ;;  %s1392_s1 = inlined_call_operand.vmem [shape: f32[2,8,384], index: 1, kind: input, shape index: {}]   ;;  %s1393_s2 = inlined_call_operand.vmem [shape: f32[2,128,19], index: 2, kind: input, shape index: {}]   ;;  %s1394_s3 = inlined_call_operand.hbm [shape: f32[2,128,384], index: 3, kind: input, shape index: {}]   ;;  %s1395_s4 = inlined_call_operand.vmem [shape: f32[2,1,128], index: 4, kind: input, shape index: {}]   ;;  %s1396_s5 = inlined_call_operand.hbm [shape: f32[2,8,128], index: 5, kind: output, shape index: {}]  }
   0x1   :  { %1409 = sst [smem:[#allocation23_spill]] %s1394_s3 }
   0x2   :  { %10 = vsyncpa [#allocation6], 0 }
   0x3   :  { %12 = vsyncpa [#allocation6 + $0x1], 0 }
   0x4   :  { %13 = vsyncpa [#allocation7], 0 }
   0x5   :  { %15 = vsyncpa [#allocation7 + $0x1], 0  ;;  %s1120_s18 = smov 0   ;;  %s1122_s19 = smov 0  }
   0x6   :  { %s1124_s20 = smov 0   ;;  %s1126_s21 = smov 0  }
   0x7   :  { %s1128_s22 = smov 0   ;;  %s1130_s23 = smov 0  }
   0x8   :  { %s1132_s24 = smov 0   ;;  %s1134_s25 = smov 0  }
   0x9   :  { %s1136_s26 = smov 0   ;;  %s1138_s27 = smov 0  }
   0xa   :  { %s1140_s28 = smov 0  }
   0xb LB: > { %1410 = sst [smem:[#allocation11_spill]] %s1043_s18  ;;  %s754_s29 = sadd.s32 4294967295, %s1083_s28   ;;  %s1083_s28 = sphi %s1140_s28, %s21_s28   ;;  %s1079_s27 = sphi %s1138_s27, %s1439_s27   ;;  %s1075_s26 = sphi %s1136_s26, %s1438_s26   ;;  %s1071_s25 = sphi %s1134_s25, %s1437_s25   ;;  %s1067_s24 = sphi %s1132_s24, %s1436_s24   ;;  %s1063_s23 = sphi %s1130_s23, %s1435_s23   ;;  %s1059_s22 = sphi %s1128_s22, %s1434_s22   ;;  %s1055_s21 = sphi %s1126_s21, %s1433_s21   ;;  %s1051_s20 = sphi %s1124_s20, %s1432_s20   ;;  %s1047_s19 = sphi %s1122_s19, %s1441_s19   ;;  %s1043_s18 = sphi %s1120_s18, %s1440_s18  }
   0xc   : > { %1411 = sst [smem:[#allocation12_spill]] %s1051_s20  ;;  %s755_s30 = sadd.s32 4294967294, %s1083_s28  }
   0xd   : > { %1412 = sst [smem:[#allocation13_spill]] %s1059_s22  ;;  %s30_s6 = sadd.s32 1, %s1075_s26 }
   0xe   : > { %1413 = sst [smem:[#allocation14_spill]] %s1063_s23  ;;  %s33_s7 = sadd.s32 1, %s1079_s27 }
   0xf   : > { %1414 = sst [smem:[#allocation15_spill]] %s1075_s26  ;;  %p31_p0 = scmp.ge.s32.totalorder %s30_s6, 3 }
  0x10   : > { %1415 = sst [smem:[#allocation16_spill]] %s1079_s27  ;;  %s122_s8 = sadd.s32 1, %s1063_s23 }
  0x11   : > { %1416 = sst [smem:[#allocation17_spill]] %s1083_s28  ;;  %p129_p1 = scmp.ne.s32.totalorder %s1063_s23, %s1059_s22 }
  0x12   : > { %p130_p2 = scmp.eq.s32.totalorder %s1083_s28, 0  ;;  %s1443_s6 = smov (%p31_p0, %s30_s6), 0 }
  0x13   : > { %1417 = sst [smem:[#allocation18_spill]] %s1443_s6  ;;  %s1445_s7 = smov (!%p31_p0, %s33_s7), %s1079_s27 }
  0x14   : > { %s118_s9 = ssub.s32 %s1075_s26, %s1443_s6  ;;  %p1186_p3 = por %p130_p2, %p129_p1 }
  0x15   : > { %p35_p4 = scmp.ge.s32.totalorder %s1445_s7, 2  ;;  %p135_p5 = scmp.ne.s32.totalorder %s1059_s22, %s1055_s21 }
  0x16   : > { %p136_p6 = scmp.eq.s32.totalorder %s754_s29, 0  ;;  %s174_s11 = sadd.s32 1, %s1051_s20 }
  0x17   : > { %s1447_s7 = smov (%p35_p4, %s1445_s7), 0  ;;  %p184_p8 = scmp.ne.s32.totalorder %s1051_s20, %s1047_s19 }
  0x18   : > { %1419 = sst [smem:[#allocation19_spill]] %s1447_s7  ;;  %p1194_p7 = por %p136_p6, %p135_p5 }
  0x19   : > { %s117_s13 = ssub.s32 %s1079_s27, %s1447_s7  ;;  %p185_p9 = scmp.eq.s32.totalorder %s754_s29, 5 }
  0x1a   : > { %s119_s14 = sor.u32 %s118_s9, %s117_s13  ;;  %p172_p10 = scmp.eq.s32.totalorder %s117_s13, 0 }
  0x1b   : > { %p120_p11 = scmp.eq.s32.totalorder %s119_s14, 0  ;;  %p1202_p12 = por %p185_p9, %p184_p8 }
  0x1c   : > { %s1207_s16 = scalar_select %p172_p10, %s1051_s20, %s174_s11  }
  0x1d   : > { %s1210_s17 = scalar_select %p120_p11, %s1063_s23, %s122_s8  }
  0x1e   : > { %1422 = sst [smem:[#allocation20_spill]] %s1207_s16  ;;  %p190_p13 = scmp.ne.s32.totalorder %s1047_s19, %s1043_s18 }
  0x1f   : > { %1423 = sst [smem:[#allocation21_spill]] %s1210_s17  ;;  %p191_p0 = scmp.eq.s32.totalorder %s755_s30, 5 }
  0x20   : > { %p821_p1 = scmp.lt.s32.totalorder %s1083_s28, 6  ;;  %s237_s29 = sand.u32 1, %s1063_s23  }
  0x21   : > { %p1215_p2 = por %p191_p0, %p190_p13  ;;  %s758_s9 = sshll.u32 %s237_s29, 7 }
  0x22   : > { %s807_s13 = smul.u32 48, %s1079_s27  ;;  %s241_s14 = scalar_lea.vmem [#allocation5], %s758_s9 }
  0x23   : > { %s1424_s21 = scalar_select %p1215_p2, 1, 0 }
  0x24   : > { %s250_s7 = sshll.u32 %s241_s14, 4  ;;  %p814_p4 = pnand %p821_p1, %p1186_p3  ;;  %s251_s7 = int_to_ptr.vmem [resolvable:$true] %s250_s7 }
  0x25   : > { %1425 = sst [smem:[#allocation22_spill]] %s1424_s21  ;;  %s245_s11 = sadd.s32 %s1075_s26, %s807_s13 }
  0x26   : > { %s759_s8 = sshll.u32 %s245_s11, 3  ;;  %s1426_s3 = sld [smem:[#allocation23_spill]] }
  0x27   : > { %s238_s20 = scalar_lea.sflag [#allocation6], %s237_s29  ;;  %s1085_s21 = smov 384  }
  0x28   : > { %s1086_s23 = smov 128   ;;  %s1087_s18 = smov 8  }
  0x29   : > { %p760_p5 = scmp.ge.s32.totalorder %s1083_s28, 1  ;;  %p264_p6 = scmp.lt.s32.totalorder %s1083_s28, 7 }
  0x2b   : > { %p265_p8 = pnand %p760_p5, %p264_p6 }
  0x2c   : > { %s247_s30 = scalar_lea.hbm %s1426_s3, %s759_s8  ;;  %s270_s10 = sand.u32 (!%p265_p8), 1, %s1059_s22  }
  0x2d   : > { %s248_s16 = sshll.u32 %s247_s30, 4  ;;  %268 = sbr.rel (%p265_p8) target bundleno = 679 (0x2a7), region = 40  ;;  %s249_s16 = int_to_ptr.hbm [resolvable:$true] %s248_s16 }
  0x2e   : > { %816 = dma.hbm_to_vmem [thread:$0]  (!%p814_p4), %s249_s16, 2048, %s251_s7, %s238_s20, %s1085_s21, %s1086_s23, %s1087_s18  }
  0x2f   : > { %s761_s9 = sshll.u32 (!%p265_p8), %s270_s10, 7  ;;  %s271_s13 = scalar_lea.sflag (!%p265_p8), [#allocation6], %s270_s10 }
  0x30   : > { %s1230_s14 = scalar_lea.vmem (!%p265_p8), [#allocation5], %s761_s9 }
  0x32   : > { %1034 = dma.done.wait (%p1194_p7), %s271_s13, 2048  }
  0x33   : > { %1036 = vsyncadd (%p1194_p7), %s271_s13, 4294965248  ;;  %s1403_s18 = sand.u32 1, %s1047_s19   ;;  %p322_p3 = scmp.lt.s32.totalorder %s1071_s25, 1 }
  0x34   : > { %s1240_s20 = sshll.u32 %s1403_s18, 3  ;;  %p328_p9 = scmp.lt.s32.totalorder %s1067_s24, 2 }
  0x35   : > { %s1244_s23 = scalar_select %p322_p3, %s1071_s25, 1 }
  0x36   : > { %s329_s6 = scalar_select %p328_p9, %s1067_s24, 2 }
  0x37   : > { %s763_s7 = sshll.u32 %s1244_s23, 3  ;;  %s808_s12 = smul.u32 3, %s1244_s23 }
  0x38   : > { %s1252_s21 = scalar_lea.vmem %s1391_s0, %s763_s7  ;;  %s790_s29 = sshll.u32 %s1244_s23, 7 }
  0x39   : > { %s331_s11 = sadd.s32 %s808_s12, %s329_s6  ;;  %s1258_s10 = scalar_lea.vmem %s1393_s2, %s790_s29 }
  0x3a   : > { %s764_s9 = sshll.u32 %s331_s11, 3  ;;  %s341_s3 = scalar_lea.vmem %s1395_s4, %s1244_s23 }
  0x3b   : > { %s333_s22 = scalar_lea.vmem %s1392_s1, %s764_s9  ;;  %s321_s28 = scalar_lea.vmem [#allocation8], %s1240_s20 }
  0x3c   : > { %p767_p7 = scmp.ne.s32.totalorder %s1067_s24, 0 }
  0x3e   : > { %345 = sbr.rel (%p767_p7) target bundleno = 72 (0x48), region = 48 }
  0x43   : > { %vm348_vm0 = vcmask 7168   ;;  %v1088_v0 = vmov 0.0  }
  0x44   : > { %346 = vst [vmem:[#allocation2] sm:$0xff] %v1088_v0 }
  0x45   : > { %347 = vst [vmem:[#allocation2 + $0x8] sm:$0xff] %v1088_v0 }
  0x46   : > { %349 = vst.msk [vmem:[#allocation3] sm:$0xff] %vm348_vm0, %v1088_v0 }
  0x47   : > { %350 = vst.msk [vmem:[#allocation4] sm:$0xff] %vm348_vm0, %v1088_v0 }
  0x48 PF: > { %v367_v1 = vld [vmem:[%s1230_s14 + $0x78] sm:$0xff]  ;;  %v366_v2 = vld [vmem:[%s1230_s14 + $0x70] sm:$0xff]  ;;  %v1271_v3 = vld [vmem:[%s333_s22] sm:$0xff]  ;;  %vm436_vm7 = vcmask 7168   ;;  %p768_p10 = scmp.ne.s32.totalorder %s1067_s24, 2 }
  0x49   : > { %405 = vmatpush.xpose.msra.mxu0 %v367_v1  ;;  %791 = vmatpush.xpose.msra.mxu1 %v367_v1  ;;  %v368_v4 = vand.u32 2147483647, %v1271_v3  ;;  %v365_v5 = vld [vmem:[%s1230_s14 + $0x68] sm:$0xff]  ;;  %v364_v8 = vld [vmem:[%s1230_s14 + $0x60] sm:$0xff]  ;;  %v363_v9 = vld [vmem:[%s1230_s14 + $0x58] sm:$0xff]  ;;  %v372_v28 = vmax.f32 %v1271_v3, 0.0 }
  0x4a   : > { %v362_v12 = vld [vmem:[%s1230_s14 + $0x50] sm:$0xff]  ;;  %v361_v13 = vld [vmem:[%s1230_s14 + $0x48] sm:$0xff]  ;;  %v360_v16 = vld [vmem:[%s1230_s14 + $0x40] sm:$0xff]  ;;  %vm399_vm6 = vcmp.ge.f32.partialorder %v1271_v3, 0.0  ;;  %v402_v44 = vsub.f32 0.0, %v1271_v3 }
  0x4b   : > { %v369_v6 = vsub.f32 0.0, %v368_v4  ;;  %v359_v26 = vld [vmem:[%s1230_s14 + $0x38] sm:$0xff]  ;;  %v358_v33 = vld [vmem:[%s1230_s14 + $0x30] sm:$0xff]  ;;  %v357_v37 = vld [vmem:[%s1230_s14 + $0x28] sm:$0xff] }
  0x4c   : > { %v356_v39 = vld [vmem:[%s1230_s14 + $0x20] sm:$0xff]  ;;  %v355_v40 = vld [vmem:[%s1230_s14 + $0x18] sm:$0xff]  ;;  %v354_v41 = vld [vmem:[%s1230_s14 + $0x10] sm:$0xff] }
  0x4d   : > { %406 = vmatpush.xpose.msra.mxu0 %v366_v2  ;;  %792 = vmatpush.xpose.msra.mxu1 %v366_v2  ;;  %v370_v7 = vmul.f32 1.442695, %v369_v6  ;;  %v353_v42 = vld [vmem:[%s1230_s14 + $0x8] sm:$0xff]  ;;  %v352_v43 = vld [vmem:[%s1230_s14] sm:$0xff]  ;;  %v432_v45 = vld [vmem:[#allocation3] sm:$0xff] }
  0x4e   : > { %v438_v48 = vld [vmem:[#allocation4] sm:$0xff]  ;;  %v403_v51 = vld [vmem:[#allocation2] sm:$0xff]  ;;  %v404_v52 = vld [vmem:[#allocation2 + $0x8] sm:$0xff] }
  0x4f   : > { %916 = vpow2.f32 %v370_v7 }
  0x51   : > { %407 = vmatpush.xpose.msra.mxu0 %v365_v5  ;;  %793 = vmatpush.xpose.msra.mxu1 %v365_v5 }
  0x55   : > { %408 = vmatpush.xpose.msra.mxu0 %v364_v8  ;;  %794 = vmatpush.xpose.msra.mxu1 %v364_v8  ;;  %v917_v10 = vpop.eup %916 }
  0x56   : > { %v373_v11 = vadd.f32 1.0, %v917_v10  ;;  %v376_v15 = vmul.f32 -0.5, %v917_v10  ;;  %v379_v23 = vand.u32 2147483647, %v917_v10 }
  0x58   : > { %918 = vrcp.f32 %v373_v11  ;;  %vm389_vm1 = vweird.f32 %v373_v11  ;;  %v395_v18 = vand.u32 2147483648, %v373_v11  ;;  %v377_v19 = vadd.f32 1.0, %v376_v15 }
  0x59   : > { %409 = vmatpush.xpose.msra.mxu0 %v363_v9  ;;  %795 = vmatpush.xpose.msra.mxu1 %v363_v9  ;;  %920 = vlog2.f32 %v373_v11  ;;  %v393_v22 = vand.u32 2147483647, %v373_v11  ;;  %vm380_vm3 = vcmp.lt.f32.partialorder %v379_v23, 0.0004427343 }
  0x5a   : > { %v378_v25 = vmul.f32 %v917_v10, %v377_v19  ;;  %v396_v29 = vor.u32 1.1754944e-38, %v395_v18 }
  0x5b   : > { %vm394_vm5 = vcmp.eq.f32.partialorder %v393_v22, 8.507059e+37 }
  0x5d   : > { %410 = vmatpush.xpose.msra.mxu0 %v362_v12  ;;  %796 = vmatpush.xpose.msra.mxu1 %v362_v12 }
  0x5e   : > { %v919_v14 = vpop.eup %918 }
  0x5f   : > { %v385_v17 = vmul.f32 %v919_v14, %v373_v11  ;;  %v921_v20 = vpop.eup %920  ;;  %vm390_vm2 = vweird.f32 %v919_v14 }
  0x60   : > { %v375_v24 = vmul.f32 0.6931472, %v921_v20  ;;  %vm391_vm4 = vmor %vm389_vm1, %vm390_vm2 }
  0x61   : > { %411 = vmatpush.xpose.msra.mxu0 %v361_v13  ;;  %797 = vmatpush.xpose.msra.mxu1 %v361_v13  ;;  %v386_v21 = vsub.f32 1.0, %v385_v17 }
  0x62   : > { %v381_v30 = vsel %vm380_vm3, %v378_v25, %v375_v24 }
  0x63   : > { %v387_v27 = vmul.f32 %v919_v14, %v386_v21  ;;  %v382_v32 = vadd.f32 %v381_v30, %v372_v28 }
  0x65   : > { %412 = vmatpush.xpose.msra.mxu0 %v360_v16  ;;  %798 = vmatpush.xpose.msra.mxu1 %v360_v16  ;;  %v388_v31 = vadd.f32 %v919_v14, %v387_v27 }
  0x66   : > { %433 = vadd.xlane.f32.xlu0 %v382_v32 }
  0x67   : > { %v392_v34 = vsel %vm391_vm4, %v919_v14, %v388_v31 }
  0x68   : > { %v397_v35 = vsel %vm394_vm5, %v396_v29, %v392_v34 }
  0x69   : > { %413 = vmatpush.xpose.msra.mxu0 %v359_v26  ;;  %799 = vmatpush.xpose.msra.mxu1 %v359_v26  ;;  %v400_v36 = vmul.f32 %v917_v10, %v397_v35 }
  0x6b   : > { %v401_v38 = vsel %vm399_vm6, %v397_v35, %v400_v36 }
  0x6d   : > { %414 = vmatpush.xpose.msra.mxu0 %v358_v33  ;;  %800 = vmatpush.xpose.msra.mxu1 %v358_v33 }
  0x6e   : > { %439 = vadd.xlane.f32.xlu0 %v401_v38 }
  0x71   : > { %415 = vmatpush.xpose.msra.mxu0 %v357_v37  ;;  %801 = vmatpush.xpose.msra.mxu1 %v357_v37 }
  0x75   : > { %416 = vmatpush.xpose.msra.mxu0 %v356_v39  ;;  %802 = vmatpush.xpose.msra.mxu1 %v356_v39 }
  0x79   : > { %417 = vmatpush.xpose.msra.mxu0 %v355_v40  ;;  %803 = vmatpush.xpose.msra.mxu1 %v355_v40 }
  0x7d   : > { %418 = vmatpush.xpose.msra.mxu0 %v354_v41  ;;  %804 = vmatpush.xpose.msra.mxu1 %v354_v41 }
  0x81   : > { %419 = vmatpush.xpose.msra.mxu0 %v353_v42  ;;  %805 = vmatpush.xpose.msra.mxu1 %v353_v42 }
  0x85   : > { %420 = vmatpush.xpose.msra.mxu0 %v352_v43  ;;  %806 = vmatpush.xpose.msra.mxu1 %v352_v43 }
  0x88   : > { %421 = vmatmul.f32.vlgmr.msra.gmra.mxu0 %v401_v38  ;;  %424 = vmatmul.f32.vlgmr.msra.gmra.mxu1 %v402_v44 }
  0xd9   : > { %v434_v46 = vpop.xlane.xlu0 %433 }
  0xda   : > { %v435_v47 = vadd.f32 %v434_v46, %v432_v45 }
  0xdc   : > { %437 = vst.msk [vmem:[#allocation3] sm:$0xff] %vm436_vm7, %v435_v47 }
  0xe1   : > { %v440_v49 = vpop.xlane.xlu0 %439 }
  0xe2   : > { %v441_v50 = vadd.f32 %v440_v49, %v438_v48 }
  0xe4   : > { %442 = vst.msk [vmem:[#allocation4] sm:$0xff] %vm436_vm7, %v441_v50 }
 0x105   : > { %v422_v53 = vpop.f32.mrf.mxu0  ;;  %v425_v54 = vpop.f32.mrf.mxu1  ;;  %446 = sbr.rel (%p768_p10) target bundleno = 664 (0x298), region = 52 }
 0x106   : > { %v428_v55 = vadd.f32 %v422_v53, %v403_v51  ;;  %v429_v56 = vadd.f32 %v425_v54, %v404_v52 }
 0x108   : > { %430 = vst [vmem:[#allocation2] sm:$0xff] %v428_v55 }
 0x109   : > { %431 = vst [vmem:[#allocation2 + $0x8] sm:$0xff] %v429_v56 }
 0x10a   : > { %v449_v57 = vld [vmem:[%s1252_s21] sm:$0xff]  ;;  %vm450_vm8 = vcmask 154624   ;;  %v490_v59 = vld [vmem:[%s1258_s10 + $0x78] sm:$0xff]  ;;  %v489_v60 = vld [vmem:[%s1258_s10 + $0x70] sm:$0xff]  ;;  %v1089_v63 = vmov 0  }
 0x10b   : > { %v451_v58 = vsel %vm450_vm8, %v449_v57, -inf  ;;  %769 = vmatpush.xpose.msk.msra.mxu0 %vm450_vm8, %v490_v59  ;;  %v574_v61 = vld [vmem:[#allocation4] sm:$0xff]  ;;  %v488_v62 = vld [vmem:[%s1258_s10 + $0x68] sm:$0xff]  ;;  %922 = vset.pattern.permute.xlu1 %v1089_v63  ;;  %v487_v0 = vld [vmem:[%s1258_s10 + $0x60] sm:$0xff] }
 0x10c   : > { %452 = vmax.xlane.f32.xlu0 %v451_v58  ;;  %577 = vperm.xlu1 %922, %v574_v61   ;;  %v486_v1 = vld [vmem:[%s1258_s10 + $0x58] sm:$0xff]  ;;  %v485_v2 = vld [vmem:[%s1258_s10 + $0x50] sm:$0xff]  ;;  %v484_v6 = vld [vmem:[%s1258_s10 + $0x48] sm:$0xff] }
 0x10d   : > { %923 = vset.pattern.permute.xlu0 %v1089_v63  ;;  %v483_v7 = vld [vmem:[%s1258_s10 + $0x40] sm:$0xff]  ;;  %v482_v9 = vld [vmem:[%s1258_s10 + $0x38] sm:$0xff]  ;;  %v481_v11 = vld [vmem:[%s1258_s10 + $0x30] sm:$0xff] }
 0x10e   : > { %v480_v12 = vld [vmem:[%s1258_s10 + $0x28] sm:$0xff]  ;;  %v479_v13 = vld [vmem:[%s1258_s10 + $0x20] sm:$0xff]  ;;  %v478_v14 = vld [vmem:[%s1258_s10 + $0x18] sm:$0xff] }
 0x10f   : > { %770 = vmatpush.xpose.msk.msra.mxu0 %vm450_vm8, %v489_v60  ;;  %v477_v15 = vld [vmem:[%s1258_s10 + $0x10] sm:$0xff]  ;;  %v476_v17 = vld [vmem:[%s1258_s10 + $0x8] sm:$0xff]  ;;  %v475_v18 = vld [vmem:[%s1258_s10] sm:$0xff] }
 0x110   : > { %v563_v16 = vld [vmem:[#allocation3] sm:$0xff]  ;;  %v924_v31 = vld [vmem:[%s341_s3] ss:$0 sm:$0xff]  ;;  %v448_v47 = vld [vmem:[#allocation2 + $0x8] sm:$0xff] }
 0x111   : > { %v447_v39 = vld [vmem:[#allocation2] sm:$0xff] }
 0x112   : > { %v572_v43 = vmul.f32 2.0, %v447_v39 }
 0x113   : > { %771 = vmatpush.xpose.msk.msra.mxu0 %vm450_vm8, %v488_v62 }
 0x114   : > { %566 = vperm.xlu1 %922, %v563_v16   ;;  %v573_v48 = vadd.f32 1.0, %v572_v43 }
 0x117   : > { %772 = vmatpush.xpose.msk.msra.mxu0 %vm450_vm8, %v487_v0 }
 0x11b   : > { %773 = vmatpush.xpose.msk.msra.mxu0 %vm450_vm8, %v486_v1 }
 0x11f   : > { %774 = vmatpush.xpose.msk.msra.mxu0 %vm450_vm8, %v485_v2 }
 0x123   : > { %775 = vmatpush.xpose.msk.msra.mxu0 %vm450_vm8, %v484_v6 }
 0x127   : > { %776 = vmatpush.xpose.msk.msra.mxu0 %vm450_vm8, %v483_v7 }
 0x12b   : > { %777 = vmatpush.xpose.msk.msra.mxu0 %vm450_vm8, %v482_v9 }
 0x12f   : > { %778 = vmatpush.xpose.msk.msra.mxu0 %vm450_vm8, %v481_v11 }
 0x133   : > { %779 = vmatpush.xpose.msk.msra.mxu0 %vm450_vm8, %v480_v12 }
 0x137   : > { %780 = vmatpush.xpose.msk.msra.mxu0 %vm450_vm8, %v479_v13 }
 0x13b   : > { %781 = vmatpush.xpose.msk.msra.mxu0 %vm450_vm8, %v478_v14 }
 0x13f   : > { %782 = vmatpush.xpose.msk.msra.mxu0 %vm450_vm8, %v477_v15 }
 0x143   : > { %783 = vmatpush.xpose.msk.msra.mxu0 %vm450_vm8, %v476_v17 }
 0x147   : > { %784 = vmatpush.xpose.msk.msra.mxu0 %vm450_vm8, %v475_v18 }
 0x17e   : > { %v578_v32 = vpop.permute.xlu1 %577 }
 0x17f   : > { %v453_v3 = vpop.xlane.xlu0 %452  ;;  %v583_v33 = vadd.f32 %v924_v31, %v578_v32 }
 0x180   : > { %v454_v4 = vsub.f32 %v449_v57, %v453_v3 }
 0x181   : > { %v584_v34 = vadd.f32 1.0, %v583_v33 }
 0x182   : > { %v455_v5 = vmul.f32 1.442695, %v454_v4 }
 0x183   : > { %vm590_vm13 = vweird.f32 %v584_v34  ;;  %v596_v40 = vand.u32 2147483648, %v584_v34  ;;  %v594_v42 = vand.u32 2147483647, %v584_v34 }
 0x184   : > { %925 = vpow2.f32 %v455_v5 }
 0x185   : > { %v597_v44 = vor.u32 1.1754944e-38, %v596_v40  ;;  %vm595_vm0 = vcmp.eq.f32.partialorder %v594_v42, 8.507059e+37 }
 0x186   : > { %v567_v46 = vpop.permute.xlu1 %566 }
 0x187   : > { %v569_v50 = vadd.f32 %v567_v46, %v448_v47 }
 0x189   : > { %v570_v53 = vmul.f32 0.0033333334, %v569_v50 }
 0x18a   : > { %v926_v8 = vpop.eup %925 }
 0x18b   : > { %v457_v10 = vsel %vm450_vm8, %v926_v8, 0.0 }
 0x18c   : > { %458 = vadd.xlane.f32.xlu0 %v457_v10 }
 0x1ff   : > { %v459_v19 = vpop.xlane.xlu0 %458 }
 0x200   : > { %927 = vrcp.f32 %v459_v19  ;;  %v471_v23 = vand.u32 2147483648, %v459_v19  ;;  %v469_v25 = vand.u32 2147483647, %v459_v19  ;;  %vm465_vm10 = vweird.f32 %v459_v19 }
 0x201   : > { %929 = vrcp.f32 %v584_v34 }
 0x202   : > { %v472_v27 = vor.u32 1.1754944e-38, %v471_v23  ;;  %vm470_vm12 = vcmp.eq.f32.partialorder %v469_v25, 8.507059e+37 }
 0x206   : > { %v928_v20 = vpop.eup %927 }
 0x207   : > { %v461_v21 = vmul.f32 %v928_v20, %v459_v19  ;;  %vm466_vm9 = vweird.f32 %v928_v20  ;;  %v930_v35 = vpop.eup %929 }
 0x208   : > { %vm467_vm11 = vmor %vm465_vm10, %vm466_vm9  ;;  %v586_v36 = vmul.f32 %v930_v35, %v584_v34  ;;  %vm591_vm14 = vweird.f32 %v930_v35 }
 0x209   : > { %v462_v22 = vsub.f32 1.0, %v461_v21  ;;  %vm592_vm15 = vmor %vm590_vm13, %vm591_vm14 }
 0x20a   : > { %v587_v37 = vsub.f32 1.0, %v586_v36 }
 0x20b   : > { %v463_v24 = vmul.f32 %v928_v20, %v462_v22 }
 0x20c   : > { %v588_v38 = vmul.f32 %v930_v35, %v587_v37 }
 0x20d   : > { %v464_v26 = vadd.f32 %v928_v20, %v463_v24 }
 0x20e   : > { %v589_v41 = vadd.f32 %v930_v35, %v588_v38 }
 0x20f   : > { %v468_v28 = vsel %vm467_vm11, %v928_v20, %v464_v26 }
 0x210   : > { %v473_v29 = vsel %vm470_vm12, %v472_v27, %v468_v28  ;;  %v593_v45 = vsel %vm592_vm15, %v930_v35, %v589_v41 }
 0x211   : > { %v474_v30 = vmul.f32 %v926_v8, %v473_v29  ;;  %v598_v49 = vsel %vm595_vm0, %v597_v44, %v593_v45 }
 0x212   : > { %v599_v51 = vmul.f32 %v598_v49, %v573_v48 }
 0x213   : > { %785 = vmatmul.msk.f32.vlgmr.msra.gmra.mxu0 %vm450_vm8, %v474_v30 }
 0x214   : > { %v600_v55 = vsub.f32 1.0, %v599_v51 }
 0x290   : > { %v559_v52 = vpop.f32.mrf.mxu0 }
 0x291   : > { %v562_v54 = vsub.f32 0.0, %v559_v52 }
 0x293   : > { %v601_v56 = vadd.f32 %v570_v53, %v562_v54 }
 0x295   : > { %v602_v57 = vadd.f32 %v601_v56, %v600_v55 }
 0x297   : > { %603 = vst [vmem:[%s321_s28] sm:$0xff] %v602_v57 }
 0x298 PF: > { %s787_s3 = sshll.u32 %s1071_s25, 3  ;;  %s617_s18 = sshll.u32 %s321_s28, 4  ;;  %s618_s18 = int_to_ptr.vmem [resolvable:$true] %s617_s18 }
 0x299   : > { %s615_s14 = scalar_lea.hbm %s1396_s5, %s787_s3  ;;  %s1427_s6 = sand.u32 1, %s1047_s19  }
 0x29a   : > { %s619_s23 = sshll.u32 %s615_s14, 4  ;;  %s605_s7 = scalar_lea.sflag [#allocation7], %s1427_s6  ;;  %s620_s23 = int_to_ptr.hbm [resolvable:$true] %s619_s23 }
 0x29b   : > { %s975_s12 = sshra.s32 %s620_s23, 4  ;;  %s981_s21 = scalar_lea.hbm %s1396_s5, 16  ;;  %s976_s12 = int_to_ptr.hbm [resolvable:$true] %s975_s12 }
 0x29c   : > { %s977_s16 = scalar_lea.hbm %s976_s12, 8  ;;  %p982_p1 = scmp.lt.s32.totalorder %s976_s12, %s1396_s5 }
 0x29d   : > { %p978_p11 = scmp.ne.s32.totalorder %s976_s12, %s977_s16  ;;  %p983_p4 = scmp.lt.s32.totalorder %s981_s21, %s977_s16 }
 0x29f   : > { %p979_p13 = pnand %p978_p11, %p1202_p12  ;;  %p984_p5 = por %p983_p4, %p982_p1 }
 0x2a1   : > { %p980_p0 = pneg %p979_p13 }
 0x2a3   : > { %p985_p6 = pnand %p984_p5, %p980_p0 }
 0x2a5   : > { %988 = shalt.err (!%p985_p6)
}
 0x2a6   : > { %811 = dma.vmem_to_hbm [thread:$0]  (%p1202_p12), %s618_s18, 128, %s620_s23, %s605_s7  }
 0x2a7 PF: > { %s1428_s28 = sld [smem:[#allocation17_spill]] }
 0x2a8   : > { %s1429_s20 = sld [smem:[#allocation11_spill]] }
 0x2ad   : > { %p822_p8 = scmp.ge.s32.totalorder %s1428_s28, 2 }
 0x2ae   : > { %s631_s30 = sand.u32 1, %s1429_s20  }
 0x2af   : > { %p818_p3 = pnand %p822_p8, %p1215_p2  ;;  %s632_s10 = scalar_lea.sflag [#allocation7], %s631_s30 }
 0x2b1   : > { %p819_p9 = pneg %p818_p3 }
 0x2b3   : > { %1038 = dma.done.wait (%p819_p9), %s632_s10, 128  }
 0x2b4   : > { %1040 = vsyncadd (%p819_p9), %s632_s10, 4294967168  ;;  %s21_s28 = sadd.s32 1, %s1428_s28   ;;  %s1431_s9 = sld [smem:[#allocation12_spill]] }
 0x2b5   : > { %p18_p7 = scmp.ge.s32.totalorder %s21_s28, 8   ;;  %s1432_s20 = sld [smem:[#allocation20_spill]] }
 0x2b6   : > { %s1433_s21 = sld [smem:[#allocation13_spill]]  ;;  %s1440_s18 = smov %s1047_s19 }
 0x2b7   : > { %s1434_s22 = sld [smem:[#allocation14_spill]] }
 0x2b8   : > { %s1435_s23 = sld [smem:[#allocation21_spill]]  ;;  %20 = sbr.rel (!%p18_p7) target bundleno = 11 (0xb), region = 105 }
 0x2b9   : > { %s1436_s24 = sld [smem:[#allocation15_spill]] }
 0x2ba   : > { %s1437_s25 = sld [smem:[#allocation16_spill]]  ;;  %s1441_s19 = smov %s1431_s9 }
 0x2bb   : > { %s1438_s26 = sld [smem:[#allocation18_spill]] }
 0x2bc   : > { %s1439_s27 = sld [smem:[#allocation19_spill]] }
 0x2bd   :  { %638 = vsyncpa [#allocation6], 1 }
 0x2be   :  { %640 = vsyncpa [#allocation6 + $0x1], 1 }
 0x2bf   :  { %641 = vsyncpa [#allocation7], 1 }
 0x2c0   :  { %643 = vsyncpa [#allocation7 + $0x1], 1 }

</bundles_post_ra>
